<compile_context>
chip_gen: v7x
topology: tpu7x:2x2x1
jax: 0.10.0
libtpu: 0.0.40
codegen_flags: <defaults>
</compile_context>

<pallas_src>
import jax
import jax.numpy as jnp
from jax.experimental import pallas as pl
from jax.experimental.pallas import tpu as pltpu

# ---------------------------------------------------------------------------
# Config (small, deterministic)
# ---------------------------------------------------------------------------
B, S, D = 2, 8, 32
H = 4
DH = D // H
F = 64
M = B * S                    # 16 rows processed in one invocation
HM = H * M                   # 64
SHARPEN = 2.0
EPS = 1e-5
NEG_INF = -1e30

# ---- weight slab (D rows) lane offsets, 128-aligned block starts ----
OFF_PT = 0                   # [w_pp | w_tg]                 width 2D  = 64
OFF_QKV = 128                # [wq' | wk' | wv'] (g1 folded) width 3D  = 96
OFF_O = 256                  # wo                            width D   = 32
OFF_EG = 384                 # [w_elem0..4' | w_gate'] (g2)  width 5D+5 = 165
OFF_W1 = 640                 # w1' (g3 folded)               width F   = 64
OFF_W2T = 768                # w2^T                          width F   = 64
WTOT = 832

# ---- aux slab: replicated bias rows + constant matrices (8-aligned rows) ----
AUX_W = 5 * D + 5            # 165 (widest row)
AR_B_PT = 0                  # (M, 2D)   bias pos|timing
AR_B_QKV = 16                # (M, 3D)   bias qkv (beta1 folded)
AR_B_O = 32                  # (M, D)    bias out-proj
AR_B_EG = 48                 # (M, 5D+5) bias elems|gate (beta2 folded)
AR_B_1 = 64                  # (M, F)    bias ff1 (beta3 folded)
AR_B_2 = 80                  # (M, D)    bias ff2
AR_VMASK = 96                # (HM, D)   head block-diagonal 0/1 mask
AR_BMASK = 160               # (M, HM)   cross-batch additive -1e30 mask
AR_SEG = 176                 # (HM, HM)  per-head lane-segment sum matrix
AR_EMAT = 240                # (5, 5D)   gate expansion matrix
AR_RMAT = 248                # (5D, D)   grouped lane-sum matrix
AUX_ROWS = 408

# ---- packed output slab lanes ----
OUT_USED = D + HM + 5        # 101
OUT_W = 128                  # padded to one full lane group


# ---------------------------------------------------------------------------
# Kernel (single invocation processes the whole (M, D) activation)
# ---------------------------------------------------------------------------
def _kernel(x_ref, w_ref, aux_ref, out_ref):
    x = x_ref[...]                                             # (M, D)

    def wblk(off, width):
        return w_ref[:, off:off + width]

    def bias(row, width):                                      # pre-replicated (M, width)
        return aux_ref[row:row + M, 0:width]

    def const(row, nrows, width):
        return aux_ref[row:row + nrows, 0:width]

    def normalize(h):                                          # LN affine folded into weights
        mu = jnp.mean(h, axis=-1, keepdims=True)
        var = jnp.mean((h - mu) ** 2, axis=-1, keepdims=True)
        return (h - mu) * jax.lax.rsqrt(var + EPS)

    def project(a, off, width, brow):
        return jnp.dot(a, wblk(off, width),
                       preferred_element_type=jnp.float32) + bias(brow, width)

    # --- PositionTimingLayer (fused pos|timing projection) ---
    pt = project(x, OFF_PT, 2 * D, AR_B_PT)
    pos = pt[:, 0:D]
    timing = jax.nn.sigmoid(pt[:, D:2 * D])
    x = x + timing * pos

    # --- norm1 + MechanismAttention (all heads & batches in single matmuls) ---
    # TODO(synk): attention mask argument (mask=None in this usage) not implemented.
    h1 = normalize(x)
    qkv = project(h1, OFF_QKV, 3 * D, AR_B_QKV)
    q = qkv[:, 0:D]
    k = qkv[:, D:2 * D]
    v = qkv[:, 2 * D:3 * D]

    vmaskf = const(AR_VMASK, HM, D)                            # head block-diagonal 0/1
    kbig = jnp.concatenate([k] * H, axis=0) * vmaskf           # (HM, D)
    vbig = jnp.concatenate([v] * H, axis=0) * vmaskf           # (HM, D)

    scale = SHARPEN / (DH ** 0.5)
    scores = jax.lax.dot_general(q, kbig, (((1,), (1,)), ((), ())),
                                 preferred_element_type=jnp.float32) * scale
    scores = scores + const(AR_BMASK, M, HM)                   # kill cross-batch keys
    # shared per-row max is a stability shift only (exact same softmax value);
    # per-head denominators come from one constant 0/1 matmul on the idle MXU.
    e = jnp.exp(scores - jnp.max(scores, axis=-1, keepdims=True))
    denom = jnp.dot(e, const(AR_SEG, HM, HM), preferred_element_type=jnp.float32)
    pbig = e / denom                                           # (M, HM) exact probs
    ctx = jnp.dot(pbig, vbig, preferred_element_type=jnp.float32)   # (M, D)
    x = x + project(ctx, OFF_O, D, AR_B_O)                     # dropout = identity

    # --- norm2 + FiveElementsTransformationLayer (fused branches + gate) ---
    h2 = normalize(x)
    eg = project(h2, OFF_EG, 5 * D + 5, AR_B_EG)
    branches = eg[:, 0:5 * D]
    gl = eg[:, 5 * D:5 * D + 5]
    ge = jnp.exp(gl - jnp.max(gl, axis=-1, keepdims=True))
    gate = ge / jnp.sum(ge, axis=-1, keepdims=True)            # (M, 5) exact probs
    gate_wide = jnp.dot(gate, const(AR_EMAT, 5, 5 * D),
                        preferred_element_type=jnp.float32)    # (M, 5D)
    five = jnp.dot(gate_wide * branches, const(AR_RMAT, 5 * D, D),
                   preferred_element_type=jnp.float32)         # (M, D)
    x = x + five                                               # dropout = identity

    # --- norm3 + feed-forward (w2 folded into slab as w2^T) ---
    h3 = normalize(x)
    # TODO(synk): nn.GELU() default is exact-erf; tanh approximation used here.
    hf = jax.nn.gelu(project(h3, OFF_W1, F, AR_B_1), approximate=True)
    ff = jax.lax.dot_general(hf, wblk(OFF_W2T, F), (((1,), (1,)), ((), ())),
                             preferred_element_type=jnp.float32) + bias(AR_B_2, D)
    x = x + ff

    # --- single lane-dense packed output store ---
    pad = jnp.zeros((M, OUT_W - OUT_USED), jnp.float32)
    out_ref[...] = jnp.concatenate([x, pbig, gate, pad], axis=1)


def _build_pallas_fn():
    matmul_dims = [
        (M, D, 2 * D), (M, D, 3 * D), (M, D, HM), (M, HM, HM), (M, HM, D),
        (M, D, D), (M, D, 5 * D + 5), (M, 5, 5 * D), (M, 5 * D, D),
        (M, D, F), (M, F, D),
    ]
    flops = sum(2 * a * b * c for a, b, c in matmul_dims)
    transcendentals = M * (D + HM + 5 + F + 3)
    bytes_accessed = 4 * (M * D + D * WTOT + AUX_ROWS * AUX_W + M * OUT_W)

    grid_spec = pltpu.PrefetchScalarGridSpec(
        num_scalar_prefetch=0,
        grid=(1,),
        in_specs=[
            pl.BlockSpec((M, D), lambda g: (0, 0)),
            pl.BlockSpec((D, WTOT), lambda g: (0, 0)),
            pl.BlockSpec((AUX_ROWS, AUX_W), lambda g: (0, 0)),
        ],
        out_specs=pl.BlockSpec((M, OUT_W), lambda g: (0, 0)),
    )
    return pl.pallas_call(
        _kernel,
        out_shape=jax.ShapeDtypeStruct((M, OUT_W), jnp.float32),
        grid_spec=grid_spec,
        compiler_params=pltpu.CompilerParams(dimension_semantics=("arbitrary",)),
        cost_estimate=pl.CostEstimate(flops=flops,
                                      transcendentals=transcendentals,
                                      bytes_accessed=bytes_accessed),
    )


_MECH_BLOCK = _build_pallas_fn()


@jax.jit
def mechanism_transformer_block(x, wslab, aux):
    slab = _MECH_BLOCK(x.reshape(M, D), wslab, aux)
    out = slab[:, 0:D].reshape(B, S, D)
    # (M, H*M) attention probs -> (B, H, S, S): wrapper-side layout plumbing only.
    mech_all = slab[:, D:D + HM].reshape(B, S, H, M).transpose(0, 2, 1, 3)
    mech = jnp.stack([mech_all[b, :, :, b * S:(b + 1) * S] for b in range(B)], axis=0)
    ew = slab[:, D + HM:D + HM + 5].reshape(B, S, 5)
    return out, mech, ew


# ---------------------------------------------------------------------------
# Parameter packing (26 arrays -> 2 DMA slabs, LN affines folded into weights)
# ---------------------------------------------------------------------------
def pack_params(p):
    g1, be1 = p["g1"].reshape(D, 1), p["be1"].reshape(1, D)
    g2, be2 = p["g2"].reshape(D, 1), p["be2"].reshape(1, D)
    g3, be3 = p["g3"].reshape(D, 1), p["be3"].reshape(1, D)

    w_pt = jnp.concatenate([p["w_pp"], p["w_tg"]], axis=1)
    b_pt = jnp.concatenate([p["b_pp"], p["b_tg"]], axis=1)

    w_qkv = jnp.concatenate([p["wq"], p["wk"], p["wv"]], axis=1)
    b_qkv = jnp.concatenate([p["bq"], p["bk"], p["bv"]], axis=1) + be1 @ w_qkv
    w_qkv = g1 * w_qkv

    w_eg = jnp.concatenate(
        [jnp.concatenate([p["w_elem"][e] for e in range(5)], axis=1), p["w_gate"]],
        axis=1)                                                  # (D, 5D+5)
    b_eg = jnp.concatenate([p["b_elem"].reshape(1, 5 * D), p["b_gate"]],
                           axis=1) + be2 @ w_eg
    w_eg = g2 * w_eg

    w1 = g3 * p["w1"]
    b1 = p["b1"] + be3 @ p["w1"]

    wslab = jnp.zeros((D, WTOT), jnp.float32)
    wslab = wslab.at[:, OFF_PT:OFF_PT + 2 * D].set(w_pt)
    wslab = wslab.at[:, OFF_QKV:OFF_QKV + 3 * D].set(w_qkv)
    wslab = wslab.at[:, OFF_O:OFF_O + D].set(p["wo"])
    wslab = wslab.at[:, OFF_EG:OFF_EG + 5 * D + 5].set(w_eg)
    wslab = wslab.at[:, OFF_W1:OFF_W1 + F].set(w1)
    wslab = wslab.at[:, OFF_W2T:OFF_W2T + F].set(p["w2"].T)

    aux = jnp.zeros((AUX_ROWS, AUX_W), jnp.float32)

    def put_bias(a, row, brow):
        w = brow.shape[1]
        return a.at[row:row + M, 0:w].set(jnp.tile(brow, (M, 1)))

    aux = put_bias(aux, AR_B_PT, b_pt)
    aux = put_bias(aux, AR_B_QKV, b_qkv)
    aux = put_bias(aux, AR_B_O, p["bo"])
    aux = put_bias(aux, AR_B_EG, b_eg)
    aux = put_bias(aux, AR_B_1, b1)
    aux = put_bias(aux, AR_B_2, p["b2"])

    # head block-diagonal mask for Kbig / Vbig
    vmaskf = (jnp.arange(HM)[:, None] // M == jnp.arange(D)[None, :] // DH
              ).astype(jnp.float32)
    aux = aux.at[AR_VMASK:AR_VMASK + HM, 0:D].set(vmaskf)
    # cross-batch additive mask for the merged scores
    bmask = jnp.where(jnp.arange(M)[:, None] // S == (jnp.arange(HM)[None, :] % M) // S,
                      0.0, NEG_INF).astype(jnp.float32)
    aux = aux.at[AR_BMASK:AR_BMASK + M, 0:HM].set(bmask)
    # per-head lane-segment sum (broadcasts each head's denominator back)
    segsum = (jnp.arange(HM)[:, None] // M == jnp.arange(HM)[None, :] // M
              ).astype(jnp.float32)
    aux = aux.at[AR_SEG:AR_SEG + HM, 0:HM].set(segsum)
    # gate expansion (5 -> 5D) and grouped lane-sum (5D -> D)
    emat = (jnp.arange(5 * D)[None, :] // D == jnp.arange(5)[:, None]
            ).astype(jnp.float32)
    aux = aux.at[AR_EMAT:AR_EMAT + 5, 0:5 * D].set(emat)
    rmat = (jnp.arange(5 * D)[:, None] % D == jnp.arange(D)[None, :]
            ).astype(jnp.float32)
    aux = aux.at[AR_RMAT:AR_RMAT + 5 * D, 0:D].set(rmat)

    return wslab, aux


# ---------------------------------------------------------------------------
# Deterministic parameter init
# ---------------------------------------------------------------------------
def init_params(key):
    keys = jax.random.split(key, 32)
    it = iter(keys)

    def w(shape, scale=0.05):
        return scale * jax.random.normal(next(it), shape, dtype=jnp.float32)

    return {
        "w_pp": w((D, D)), "b_pp": w((1, D)),
        "w_tg": w((D, D)), "b_tg": w((1, D)),
        "g1": jnp.ones((1, D), jnp.float32), "be1": jnp.zeros((1, D), jnp.float32),
        "g2": jnp.ones((1, D), jnp.float32), "be2": jnp.zeros((1, D), jnp.float32),
        "g3": jnp.ones((1, D), jnp.float32), "be3": jnp.zeros((1, D), jnp.float32),
        "wq": w((D, D)), "bq": w((1, D)),
        "wk": w((D, D)), "bk": w((1, D)),
        "wv": w((D, D)), "bv": w((1, D)),
        "wo": w((D, D)), "bo": w((1, D)),
        "w_elem": w((5, D, D)), "b_elem": w((5, D)),
        "w_gate": w((D, 5)), "b_gate": w((1, 5)),
        "w1": w((D, F)), "b1": w((1, F)),
        "w2": w((F, D)), "b2": w((1, D)),
    }


# ---------------------------------------------------------------------------
# Pure-JAX reference (same math) for a sanity check
# ---------------------------------------------------------------------------
def reference(x, p):
    def ln(h, g, b):
        mu = h.mean(-1, keepdims=True)
        var = ((h - mu) ** 2).mean(-1, keepdims=True)
        return (h - mu) / jnp.sqrt(var + EPS) * g + b

    pos = x @ p["w_pp"] + p["b_pp"]
    timing = jax.nn.sigmoid(x @ p["w_tg"] + p["b_tg"])
    x = x + timing * pos

    h = ln(x, p["g1"], p["be1"])
    q = (h @ p["wq"] + p["bq"]).reshape(B, S, H, DH).transpose(0, 2, 1, 3)
    k = (h @ p["wk"] + p["bk"]).reshape(B, S, H, DH).transpose(0, 2, 1, 3)
    v = (h @ p["wv"] + p["bv"]).reshape(B, S, H, DH).transpose(0, 2, 1, 3)
    scores = jnp.einsum("bhqd,bhkd->bhqk", q, k) / (DH ** 0.5) * SHARPEN
    probs = jax.nn.softmax(scores, axis=-1)
    ctx = jnp.einsum("bhqk,bhkd->bhqd", probs, v).transpose(0, 2, 1, 3).reshape(B, S, D)
    x = x + (ctx @ p["wo"] + p["bo"])

    h = ln(x, p["g2"], p["be2"])
    gate = jax.nn.softmax(h @ p["w_gate"] + p["b_gate"], axis=-1)
    five = sum(gate[..., e:e + 1] * (h @ p["w_elem"][e] + p["b_elem"][e]) for e in range(5))
    x = x + five

    h = ln(x, p["g3"], p["be3"])
    ff = jax.nn.gelu(h @ p["w1"] + p["b1"], approximate=True) @ p["w2"] + p["b2"]
    x = x + ff
    return x, probs, gate


if __name__ == "__main__":
    key = jax.random.PRNGKey(0)
    kx, kp = jax.random.split(key)
    x = jax.random.normal(kx, (B, S, D), dtype=jnp.float32)
    params = init_params(kp)
    wslab, aux = pack_params(params)

    out, mech, ew = mechanism_transformer_block(x, wslab, aux)
    jax.block_until_ready((out, mech, ew))

    ref_out, ref_mech, ref_ew = reference(x, params)
    assert out.shape == (B, S, D) and mech.shape == (B, H, S, S) and ew.shape == (B, S, 5)
    assert jnp.allclose(out, ref_out, atol=1e-3, rtol=1e-3)
    assert jnp.allclose(mech, ref_mech, atol=1e-3, rtol=1e-3)
    assert jnp.allclose(ew, ref_ew, atol=1e-3, rtol=1e-3)

    print("KERNEL_OK")
</pallas_src>

<mosaic_0001>
module attributes {stable_mosaic.version = 11 : i64} {
  func.func @_kernel(%arg0: i32, %arg1: memref<16x32xf32, #tpu.memory_space<vmem>>, %arg2: memref<32x832xf32, #tpu.memory_space<vmem>>, %arg3: memref<408x165xf32, #tpu.memory_space<vmem>>, %arg4: memref<16x128xf32, #tpu.memory_space<vmem>>) attributes {dimension_semantics = [#tpu.dimension_semantics<arbitrary>], iteration_bounds = array<i64: 1>, scalar_prefetch = 0 : i64, scratch_operands = 0 : i64, tpu.core_type = #tpu.core_type<tc>, window_params = [{pipeline_mode = #tpu.pipeline_mode<synchronous>, transform_indices = @transform_0, window_bounds = array<i64: 16, 32>}, {pipeline_mode = #tpu.pipeline_mode<synchronous>, transform_indices = @transform_1, window_bounds = array<i64: 32, 832>}, {pipeline_mode = #tpu.pipeline_mode<synchronous>, transform_indices = @transform_2, window_bounds = array<i64: 408, 165>}, {pipeline_mode = #tpu.pipeline_mode<synchronous>, transform_indices = @transform_3, window_bounds = array<i64: 16, 128>}]} {
    %c0 = arith.constant 0 : index
    %c0_0 = arith.constant 0 : index
    %0 = vector.load %arg1[%c0, %c0_0] : memref<16x32xf32, #tpu.memory_space<vmem>>, vector<16x32xf32>
    %c0_1 = arith.constant 0 : index
    %c0_2 = arith.constant 0 : index
    %1 = vector.load %arg2[%c0_1, %c0_2] : memref<32x832xf32, #tpu.memory_space<vmem>>, vector<32x64xf32>
    %cst = arith.constant dense<0.000000e+00> : vector<16x64xf32>
    %2 = tpu.matmul %0, %1, %cst {dimension_numbers = #tpu.dot_dimension_numbers<[1], [0], [0], [1], [0, 0, 1, 1], [], []>} : vector<16x32xf32>, vector<32x64xf32>, vector<16x64xf32> -> vector<16x64xf32>
    %c0_3 = arith.constant 0 : index
    %c0_4 = arith.constant 0 : index
    %3 = vector.load %arg3[%c0_3, %c0_4] : memref<408x165xf32, #tpu.memory_space<vmem>>, vector<16x64xf32>
    %4 = arith.addf %2, %3 : vector<16x64xf32>
    %5 = vector.extract_strided_slice %4 {offsets = [0, 0], sizes = [16, 32], strides = [1, 1]} : vector<16x64xf32> to vector<16x32xf32>
    %6 = vector.extract_strided_slice %4 {offsets = [0, 32], sizes = [16, 32], strides = [1, 1]} : vector<16x64xf32> to vector<16x32xf32>
    %7 = arith.negf %6 : vector<16x32xf32>
    %8 = math.exp %7 : vector<16x32xf32>
    %cst_5 = arith.constant 1.000000e+00 : f32
    %9 = vector.broadcast %cst_5 : f32 to vector<16x32xf32>
    %10 = arith.addf %9, %8 : vector<16x32xf32>
    %11 = arith.divf %9, %10 : vector<16x32xf32>
    %12 = arith.mulf %11, %5 : vector<16x32xf32>
    %13 = arith.addf %0, %12 : vector<16x32xf32>
    %cst_6 = arith.constant dense<0.000000e+00> : vector<16xf32>
    %14 = vector.multi_reduction <add>, %13, %cst_6 [1] : vector<16x32xf32> to vector<16xf32>
    %15 = vector.shape_cast %14 : vector<16xf32> to vector<16x1xf32>
    %cst_7 = arith.constant 3.200000e+01 : f32
    %16 = vector.broadcast %cst_7 : f32 to vector<16x1xf32>
    %17 = arith.divf %15, %16 : vector<16x1xf32>
    %18 = vector.broadcast %17 : vector<16x1xf32> to vector<16x32xf32>
    %19 = arith.subf %13, %18 : vector<16x32xf32>
    %20 = arith.mulf %19, %19 : vector<16x32xf32>
    %cst_8 = arith.constant dense<0.000000e+00> : vector<16xf32>
    %21 = vector.multi_reduction <add>, %20, %cst_8 [1] : vector<16x32xf32> to vector<16xf32>
    %22 = vector.shape_cast %21 : vector<16xf32> to vector<16x1xf32>
    %cst_9 = arith.constant 3.200000e+01 : f32
    %23 = vector.broadcast %cst_9 : f32 to vector<16x1xf32>
    %24 = arith.divf %22, %23 : vector<16x1xf32>
    %25 = vector.broadcast %17 : vector<16x1xf32> to vector<16x32xf32>
    %26 = arith.subf %13, %25 : vector<16x32xf32>
    %cst_10 = arith.constant 9.99999974E-6 : f32
    %27 = vector.broadcast %cst_10 : f32 to vector<16x1xf32>
    %28 = arith.addf %24, %27 : vector<16x1xf32>
    %29 = math.rsqrt %28 : vector<16x1xf32>
    %30 = vector.broadcast %29 : vector<16x1xf32> to vector<16x32xf32>
    %31 = arith.mulf %26, %30 : vector<16x32xf32>
    %c0_11 = arith.constant 0 : index
    %c128 = arith.constant 128 : index
    %32 = vector.load %arg2[%c0_11, %c128] : memref<32x832xf32, #tpu.memory_space<vmem>>, vector<32x96xf32>
    %cst_12 = arith.constant dense<0.000000e+00> : vector<16x96xf32>
    %33 = tpu.matmul %31, %32, %cst_12 {dimension_numbers = #tpu.dot_dimension_numbers<[1], [0], [0], [1], [0, 0, 1, 1], [], []>} : vector<16x32xf32>, vector<32x96xf32>, vector<16x96xf32> -> vector<16x96xf32>
    %c16 = arith.constant 16 : index
    %c0_13 = arith.constant 0 : index
    %34 = vector.load %arg3[%c16, %c0_13] : memref<408x165xf32, #tpu.memory_space<vmem>>, vector<16x96xf32>
    %35 = arith.addf %33, %34 : vector<16x96xf32>
    %36 = vector.extract_strided_slice %35 {offsets = [0, 0], sizes = [16, 32], strides = [1, 1]} : vector<16x96xf32> to vector<16x32xf32>
    %37 = vector.extract_strided_slice %35 {offsets = [0, 32], sizes = [16, 32], strides = [1, 1]} : vector<16x96xf32> to vector<16x32xf32>
    %38 = vector.extract_strided_slice %35 {offsets = [0, 64], sizes = [16, 32], strides = [1, 1]} : vector<16x96xf32> to vector<16x32xf32>
    %c96 = arith.constant 96 : index
    %c0_14 = arith.constant 0 : index
    %39 = vector.load %arg3[%c96, %c0_14] : memref<408x165xf32, #tpu.memory_space<vmem>>, vector<64x32xf32>
    %40 = tpu.concatenate %37, %37, %37, %37 in 0 : vector<16x32xf32>, vector<16x32xf32>, vector<16x32xf32>, vector<16x32xf32> -> vector<64x32xf32>
    %41 = arith.mulf %40, %39 : vector<64x32xf32>
    %42 = tpu.concatenate %38, %38, %38, %38 in 0 : vector<16x32xf32>, vector<16x32xf32>, vector<16x32xf32>, vector<16x32xf32> -> vector<64x32xf32>
    %43 = arith.mulf %42, %39 : vector<64x32xf32>
    %cst_15 = arith.constant dense<0.000000e+00> : vector<16x64xf32>
    %44 = tpu.matmul %36, %41, %cst_15 {dimension_numbers = #tpu.dot_dimension_numbers<[1], [1], [0], [0], [0, 0, 1, 0], [], []>} : vector<16x32xf32>, vector<64x32xf32>, vector<16x64xf32> -> vector<16x64xf32>
    %cst_16 = arith.constant 0.707106769 : f32
    %45 = vector.broadcast %cst_16 : f32 to vector<16x64xf32>
    %46 = arith.mulf %44, %45 : vector<16x64xf32>
    %c160 = arith.constant 160 : index
    %c0_17 = arith.constant 0 : index
    %47 = vector.load %arg3[%c160, %c0_17] : memref<408x165xf32, #tpu.memory_space<vmem>>, vector<16x64xf32>
    %48 = arith.addf %46, %47 : vector<16x64xf32>
    %cst_18 = arith.constant dense<0xFF800000> : vector<16xf32>
    %49 = vector.multi_reduction <maximumf>, %48, %cst_18 [1] : vector<16x64xf32> to vector<16xf32>
    %50 = vector.shape_cast %49 : vector<16xf32> to vector<16x1xf32>
    %51 = vector.broadcast %50 : vector<16x1xf32> to vector<16x64xf32>
    %52 = arith.subf %48, %51 : vector<16x64xf32>
    %53 = math.exp %52 : vector<16x64xf32>
    %c176 = arith.constant 176 : index
    %c0_19 = arith.constant 0 : index
    %54 = vector.load %arg3[%c176, %c0_19] : memref<408x165xf32, #tpu.memory_space<vmem>>, vector<64x64xf32>
    %cst_20 = arith.constant dense<0.000000e+00> : vector<16x64xf32>
    %55 = tpu.matmul %53, %54, %cst_20 {dimension_numbers = #tpu.dot_dimension_numbers<[1], [0], [0], [1], [0, 0, 1, 1], [], []>} : vector<16x64xf32>, vector<64x64xf32>, vector<16x64xf32> -> vector<16x64xf32>
    %56 = arith.divf %53, %55 : vector<16x64xf32>
    %cst_21 = arith.constant dense<0.000000e+00> : vector<16x32xf32>
    %57 = tpu.matmul %56, %43, %cst_21 {dimension_numbers = #tpu.dot_dimension_numbers<[1], [0], [0], [1], [0, 0, 1, 1], [], []>} : vector<16x64xf32>, vector<64x32xf32>, vector<16x32xf32> -> vector<16x32xf32>
    %c0_22 = arith.constant 0 : index
    %c256 = arith.constant 256 : index
    %58 = vector.load %arg2[%c0_22, %c256] : memref<32x832xf32, #tpu.memory_space<vmem>>, vector<32x32xf32>
    %cst_23 = arith.constant dense<0.000000e+00> : vector<16x32xf32>
    %59 = tpu.matmul %57, %58, %cst_23 {dimension_numbers = #tpu.dot_dimension_numbers<[1], [0], [0], [1], [0, 0, 1, 1], [], []>} : vector<16x32xf32>, vector<32x32xf32>, vector<16x32xf32> -> vector<16x32xf32>
    %c32 = arith.constant 32 : index
    %c0_24 = arith.constant 0 : index
    %60 = vector.load %arg3[%c32, %c0_24] : memref<408x165xf32, #tpu.memory_space<vmem>>, vector<16x32xf32>
    %61 = arith.addf %59, %60 : vector<16x32xf32>
    %62 = arith.addf %13, %61 : vector<16x32xf32>
    %cst_25 = arith.constant dense<0.000000e+00> : vector<16xf32>
    %63 = vector.multi_reduction <add>, %62, %cst_25 [1] : vector<16x32xf32> to vector<16xf32>
    %64 = vector.shape_cast %63 : vector<16xf32> to vector<16x1xf32>
    %cst_26 = arith.constant 3.200000e+01 : f32
    %65 = vector.broadcast %cst_26 : f32 to vector<16x1xf32>
    %66 = arith.divf %64, %65 : vector<16x1xf32>
    %67 = vector.broadcast %66 : vector<16x1xf32> to vector<16x32xf32>
    %68 = arith.subf %62, %67 : vector<16x32xf32>
    %69 = arith.mulf %68, %68 : vector<16x32xf32>
    %cst_27 = arith.constant dense<0.000000e+00> : vector<16xf32>
    %70 = vector.multi_reduction <add>, %69, %cst_27 [1] : vector<16x32xf32> to vector<16xf32>
    %71 = vector.shape_cast %70 : vector<16xf32> to vector<16x1xf32>
    %cst_28 = arith.constant 3.200000e+01 : f32
    %72 = vector.broadcast %cst_28 : f32 to vector<16x1xf32>
    %73 = arith.divf %71, %72 : vector<16x1xf32>
    %74 = vector.broadcast %66 : vector<16x1xf32> to vector<16x32xf32>
    %75 = arith.subf %62, %74 : vector<16x32xf32>
    %cst_29 = arith.constant 9.99999974E-6 : f32
    %76 = vector.broadcast %cst_29 : f32 to vector<16x1xf32>
    %77 = arith.addf %73, %76 : vector<16x1xf32>
    %78 = math.rsqrt %77 : vector<16x1xf32>
    %79 = vector.broadcast %78 : vector<16x1xf32> to vector<16x32xf32>
    %80 = arith.mulf %75, %79 : vector<16x32xf32>
    %c0_30 = arith.constant 0 : index
    %c384 = arith.constant 384 : index
    %81 = vector.load %arg2[%c0_30, %c384] : memref<32x832xf32, #tpu.memory_space<vmem>>, vector<32x165xf32>
    %cst_31 = arith.constant dense<0.000000e+00> : vector<16x165xf32>
    %82 = tpu.matmul %80, %81, %cst_31 {dimension_numbers = #tpu.dot_dimension_numbers<[1], [0], [0], [1], [0, 0, 1, 1], [], []>} : vector<16x32xf32>, vector<32x165xf32>, vector<16x165xf32> -> vector<16x165xf32>
    %c48 = arith.constant 48 : index
    %c0_32 = arith.constant 0 : index
    %83 = vector.load %arg3[%c48, %c0_32] : memref<408x165xf32, #tpu.memory_space<vmem>>, vector<16x165xf32>
    %84 = arith.addf %82, %83 : vector<16x165xf32>
    %85 = vector.extract_strided_slice %84 {offsets = [0, 0], sizes = [16, 160], strides = [1, 1]} : vector<16x165xf32> to vector<16x160xf32>
    %86 = vector.extract_strided_slice %84 {offsets = [0, 160], sizes = [16, 5], strides = [1, 1]} : vector<16x165xf32> to vector<16x5xf32>
    %cst_33 = arith.constant dense<0xFF800000> : vector<16xf32>
    %87 = vector.multi_reduction <maximumf>, %86, %cst_33 [1] : vector<16x5xf32> to vector<16xf32>
    %88 = vector.shape_cast %87 : vector<16xf32> to vector<16x1xf32>
    %89 = vector.broadcast %88 : vector<16x1xf32> to vector<16x5xf32>
    %90 = arith.subf %86, %89 : vector<16x5xf32>
    %91 = math.exp %90 : vector<16x5xf32>
    %cst_34 = arith.constant dense<0.000000e+00> : vector<16xf32>
    %92 = vector.multi_reduction <add>, %91, %cst_34 [1] : vector<16x5xf32> to vector<16xf32>
    %93 = vector.shape_cast %92 : vector<16xf32> to vector<16x1xf32>
    %94 = vector.broadcast %93 : vector<16x1xf32> to vector<16x5xf32>
    %95 = arith.divf %91, %94 : vector<16x5xf32>
    %c240 = arith.constant 240 : index
    %c0_35 = arith.constant 0 : index
    %96 = vector.load %arg3[%c240, %c0_35] : memref<408x165xf32, #tpu.memory_space<vmem>>, vector<5x160xf32>
    %cst_36 = arith.constant dense<0.000000e+00> : vector<16x160xf32>
    %97 = tpu.matmul %95, %96, %cst_36 {dimension_numbers = #tpu.dot_dimension_numbers<[1], [0], [0], [1], [0, 0, 1, 1], [], []>} : vector<16x5xf32>, vector<5x160xf32>, vector<16x160xf32> -> vector<16x160xf32>
    %98 = arith.mulf %97, %85 : vector<16x160xf32>
    %c248 = arith.constant 248 : index
    %c0_37 = arith.constant 0 : index
    %99 = vector.load %arg3[%c248, %c0_37] : memref<408x165xf32, #tpu.memory_space<vmem>>, vector<160x32xf32>
    %cst_38 = arith.constant dense<0.000000e+00> : vector<16x32xf32>
    %100 = tpu.matmul %98, %99, %cst_38 {dimension_numbers = #tpu.dot_dimension_numbers<[1], [0], [0], [1], [0, 0, 1, 1], [], []>} : vector<16x160xf32>, vector<160x32xf32>, vector<16x32xf32> -> vector<16x32xf32>
    %101 = arith.addf %62, %100 : vector<16x32xf32>
    %cst_39 = arith.constant dense<0.000000e+00> : vector<16xf32>
    %102 = vector.multi_reduction <add>, %101, %cst_39 [1] : vector<16x32xf32> to vector<16xf32>
    %103 = vector.shape_cast %102 : vector<16xf32> to vector<16x1xf32>
    %cst_40 = arith.constant 3.200000e+01 : f32
    %104 = vector.broadcast %cst_40 : f32 to vector<16x1xf32>
    %105 = arith.divf %103, %104 : vector<16x1xf32>
    %106 = vector.broadcast %105 : vector<16x1xf32> to vector<16x32xf32>
    %107 = arith.subf %101, %106 : vector<16x32xf32>
    %108 = arith.mulf %107, %107 : vector<16x32xf32>
    %cst_41 = arith.constant dense<0.000000e+00> : vector<16xf32>
    %109 = vector.multi_reduction <add>, %108, %cst_41 [1] : vector<16x32xf32> to vector<16xf32>
    %110 = vector.shape_cast %109 : vector<16xf32> to vector<16x1xf32>
    %cst_42 = arith.constant 3.200000e+01 : f32
    %111 = vector.broadcast %cst_42 : f32 to vector<16x1xf32>
    %112 = arith.divf %110, %111 : vector<16x1xf32>
    %113 = vector.broadcast %105 : vector<16x1xf32> to vector<16x32xf32>
    %114 = arith.subf %101, %113 : vector<16x32xf32>
    %cst_43 = arith.constant 9.99999974E-6 : f32
    %115 = vector.broadcast %cst_43 : f32 to vector<16x1xf32>
    %116 = arith.addf %112, %115 : vector<16x1xf32>
    %117 = math.rsqrt %116 : vector<16x1xf32>
    %118 = vector.broadcast %117 : vector<16x1xf32> to vector<16x32xf32>
    %119 = arith.mulf %114, %118 : vector<16x32xf32>
    %c0_44 = arith.constant 0 : index
    %c640 = arith.constant 640 : index
    %120 = vector.load %arg2[%c0_44, %c640] : memref<32x832xf32, #tpu.memory_space<vmem>>, vector<32x64xf32>
    %cst_45 = arith.constant dense<0.000000e+00> : vector<16x64xf32>
    %121 = tpu.matmul %119, %120, %cst_45 {dimension_numbers = #tpu.dot_dimension_numbers<[1], [0], [0], [1], [0, 0, 1, 1], [], []>} : vector<16x32xf32>, vector<32x64xf32>, vector<16x64xf32> -> vector<16x64xf32>
    %c64 = arith.constant 64 : index
    %c0_46 = arith.constant 0 : index
    %122 = vector.load %arg3[%c64, %c0_46] : memref<408x165xf32, #tpu.memory_space<vmem>>, vector<16x64xf32>
    %123 = arith.addf %121, %122 : vector<16x64xf32>
    %124 = arith.mulf %123, %123 : vector<16x64xf32>
    %125 = arith.mulf %123, %124 : vector<16x64xf32>
    %cst_47 = arith.constant 4.471500e-02 : f32
    %126 = vector.broadcast %cst_47 : f32 to vector<16x64xf32>
    %127 = arith.mulf %126, %125 : vector<16x64xf32>
    %128 = arith.addf %123, %127 : vector<16x64xf32>
    %cst_48 = arith.constant 0.797884583 : f32
    %129 = vector.broadcast %cst_48 : f32 to vector<16x64xf32>
    %130 = arith.mulf %129, %128 : vector<16x64xf32>
    %131 = math.tanh %130 : vector<16x64xf32>
    %cst_49 = arith.constant 1.000000e+00 : f32
    %132 = vector.broadcast %cst_49 : f32 to vector<16x64xf32>
    %133 = arith.addf %132, %131 : vector<16x64xf32>
    %cst_50 = arith.constant 5.000000e-01 : f32
    %134 = vector.broadcast %cst_50 : f32 to vector<16x64xf32>
    %135 = arith.mulf %134, %133 : vector<16x64xf32>
    %136 = arith.mulf %123, %135 : vector<16x64xf32>
    %c0_51 = arith.constant 0 : index
    %c768 = arith.constant 768 : index
    %137 = vector.load %arg2[%c0_51, %c768] : memref<32x832xf32, #tpu.memory_space<vmem>>, vector<32x64xf32>
    %cst_52 = arith.constant dense<0.000000e+00> : vector<16x32xf32>
    %138 = tpu.matmul %136, %137, %cst_52 {dimension_numbers = #tpu.dot_dimension_numbers<[1], [1], [0], [0], [0, 0, 1, 0], [], []>} : vector<16x64xf32>, vector<32x64xf32>, vector<16x32xf32> -> vector<16x32xf32>
    %c80 = arith.constant 80 : index
    %c0_53 = arith.constant 0 : index
    %139 = vector.load %arg3[%c80, %c0_53] : memref<408x165xf32, #tpu.memory_space<vmem>>, vector<16x32xf32>
    %140 = arith.addf %138, %139 : vector<16x32xf32>
    %141 = arith.addf %101, %140 : vector<16x32xf32>
    %cst_54 = arith.constant 0.000000e+00 : f32
    %142 = vector.broadcast %cst_54 : f32 to vector<16x27xf32>
    %143 = tpu.concatenate %141, %56, %95, %142 in 1 : vector<16x32xf32>, vector<16x64xf32>, vector<16x5xf32>, vector<16x27xf32> -> vector<16x128xf32>
    %c0_55 = arith.constant 0 : index
    %c0_56 = arith.constant 0 : index
    %144 = vector.load %arg4[%c0_55, %c0_56] : memref<16x128xf32, #tpu.memory_space<vmem>>, vector<16x128xf32>
    tpu.vector_store %arg4[%c0_55, %c0_56], %143 {strides = array<i32>} : memref<16x128xf32, #tpu.memory_space<vmem>>, vector<16x128xf32>,
    return
  }
  func.func @transform_0(%arg0: i32) -> (i32, i32) {
    %c0_i32 = arith.constant 0 : i32
    %c0_i32_0 = arith.constant 0 : i32
    %c0_i32_1 = arith.constant 0 : i32
    return %c0_i32, %c0_i32_0 : i32, i32
  }
  func.func @transform_1(%arg0: i32) -> (i32, i32) {
    %c0_i32 = arith.constant 0 : i32
    %c0_i32_0 = arith.constant 0 : i32
    %c0_i32_1 = arith.constant 0 : i32
    return %c0_i32, %c0_i32_0 : i32, i32
  }
  func.func @transform_2(%arg0: i32) -> (i32, i32) {
    %c0_i32 = arith.constant 0 : i32
    %c0_i32_0 = arith.constant 0 : i32
    %c0_i32_1 = arith.constant 0 : i32
    return %c0_i32, %c0_i32_0 : i32, i32
  }
  func.func @transform_3(%arg0: i32) -> (i32, i32) {
    %c0_i32 = arith.constant 0 : i32
    %c0_i32_0 = arith.constant 0 : i32
    %c0_i32_1 = arith.constant 0 : i32
    return %c0_i32, %c0_i32_0 : i32, i32
  }
}

</mosaic_0001>

<bundles_post_ra>
// kernel: mechanism_transformer_block.1
= control target key start
LH: loop header
LB: loop body
LE: loop exit
PB: predicated region body
PF: predicated region fallthrough
CT: control target
= control target key end

     0   :  { %vm22_vm0 = vcmask 261120   ;;  %s1812_s28 = smov 32   ;;  %vm457_vm2 = vcmask 523264   ;;  %s1814_s16 = smov 64   ;;  %vm886_vm3 = vcmask 302336   ;;  %vm907_vm4 = vcmask 39936   ;;  %s2315_s1 = inlined_call_operand.vmem [shape: f32[32,832], index: 1, kind: input, shape index: {}]   ;;  %s2316_s0 = inlined_call_operand.vmem [shape: f32[16,32], index: 0, kind: input, shape index: {}]   ;;  %s2317_s2 = inlined_call_operand.vmem [shape: f32[408,165], index: 2, kind: input, shape index: {}]   ;;  %s2318_s3 = inlined_call_operand.vmem [shape: f32[16,128], index: 3, kind: output, shape index: {}]  }
   0x1   :  { %v16_v0 = vld [vmem:[%s2315_s1] sm:$0xff]  ;;  %v17_v1 = vld [vmem:[%s2315_s1 + $0x38] sm:$0xff]  ;;  %v18_v2 = vld [vmem:[%s2315_s1 + $0x70] sm:$0xff]  ;;  %vm930_vm5 = vcmask 1044480   ;;  %vm1367_vm7 = vcmask 785408   ;;  %vm1370_vm8 = vcmask 826368  }
   0x2   :  { %v1589_v3 = vpack.c.bf16 %v17_v1, %v16_v0  ;;  %v19_v4 = vld [vmem:[%s2315_s1 + $0xa8] sm:$0xff]  ;;  %v14_v5 = vld [vmem:[%s2316_s0] sm:$0xff]  ;;  %v21_v12 = vld [vmem:[%s2317_s2 + $0x10] sm:$0xff] }
   0x3   :  { %v1593_v6 = vpack.c.bf16 %v19_v4, %v18_v2  ;;  %1485 = vmatprep.mubr.msk.f32.mxu0 %vm22_vm0, %v14_v5  ;;  %v15_v7 = vld [vmem:[%s2316_s0 + $0x8] sm:$0xff]  ;;  %v20_v8 = vld [vmem:[%s2317_s2] sm:$0xff]  ;;  %s1813_s0 = smov 96   ;;  %v165_v44 = vld [vmem:[%s2315_s1 + $0x78] sm:$0xff] }
   0x4   :  { %1590 = vmatprep.subr.bf16.mxu0 %v1589_v3  ;;  %v163_v42 = vld [vmem:[%s2315_s1 + $0x8] sm:$0xff]  ;;  %v164_v43 = vld [vmem:[%s2315_s1 + $0x40] sm:$0xff]  ;;  %v166_v46 = vld [vmem:[%s2315_s1 + $0xb0] sm:$0xff] }
   0x5   :  { %1592 = vmatpush3.bf16.msra.mxu0 %v1589_v3  ;;  %v1597_v45 = vpack.c.bf16 %v164_v43, %v163_v42  ;;  %v1601_v47 = vpack.c.bf16 %v166_v46, %v165_v44  ;;  %v1894_v48 = vld [vmem:[%s2317_s2 + $0xc0] sm:$0xff]  ;;  %v1901_v49 = vld [vmem:[%s2317_s2 + $0xd0] sm:$0xff]  ;;  %vm1975_vm1 = vmpackc.low %vm22_vm0, %vm22_vm0 }
   0x6   :  { %1594 = vmatprep.subr.bf16.mxu0 %v1593_v6  ;;  %v1906_v50 = vld [vmem:[%s2317_s2 + $0xe0] sm:$0xff]  ;;  %v1920_v52 = vld [vmem:[%s2317_s2 + $0xf0] sm:$0xff]  ;;  %vm1716_vm6 = vmpackc.low %vm457_vm2, %vm457_vm2 }
   0x7   :  { %v1913_v51 = vld [vmem:[%s2317_s2 + $0x100] sm:$0xff]  ;;  %v1934_v54 = vld [vmem:[%s2317_s2 + $0x110] sm:$0xff] }
   0x8   :  { %v1927_v53 = vld [vmem:[%s2317_s2 + $0x120] sm:$0xff]  ;;  %v1943_v55 = vld [vmem:[%s2317_s2 + $0x130] sm:$0xff] }
   0x9   :  { %1596 = vmatpush3.bf16.msra.mxu0 %v1593_v6 }
   0xa   :  { %1598 = vmatprep.subr.bf16.mxu0 %v1597_v45 }
   0xc   :  { %1486 = vmatmul.mubr.msk.f32.vlgmr.msra.gmra.mrb[0].mxu0 %vm22_vm0, %v15_v7 }
   0xd   :  { %1600 = vmatpush3.bf16.msra.mxu0 %v1597_v45 }
   0xe   :  { %1602 = vmatprep.subr.bf16.mxu0 %v1601_v47 }
  0x11   :  { %1604 = vmatpush3.bf16.msra.mxu0 %v1601_v47 }
  0xdf   :  { %v1487_v9 = vpop.f32.mrb[0].mxu0 }
  0xe0   :  { %v95_v10 = vpop.f32.mrb[1].mxu0  ;;  %v101_v13 = vadd.f32 %v1487_v9, %v21_v12  ;;  %v167_v9 = vld [vmem:[%s2317_s2 + $0x20] sm:$0xff] }
  0xe1   :  { %v96_v11 = vadd.f32 %v95_v10, %v20_v8  ;;  %v168_v8 = vld [vmem:[%s2317_s2 + $0x30] sm:$0xff] }
  0xe2   :  { %v1382_v15 = vmul.f32 -1.442695, %v101_v13 }
  0xe3   :  { %118 = vrot.lane.b32.xlu0 %v96_v11, %s1812_s28  ;;  %v1381_v14 = vmul.f32 -1.442695, %v96_v11 }
  0xe5   :  { %1772 = vpow2.f32 %v1381_v14 }
  0xe6   :  { %1774 = vpow2.f32 %v1382_v15 }
  0xe7   :  { %120 = vrot.lane.b32.xlu0 %v101_v13, %s1812_s28 }
  0xef   :  { %v1773_v16 = vpop.eup %1772 }
  0xf0   :  { %v110_v17 = vadd.f32 1.0, %v1773_v16  ;;  %v1775_v18 = vpop.eup %1774 }
  0xf1   :  { %v111_v19 = vadd.f32 1.0, %v1775_v18 }
  0xf2   :  { %1776 = vrcp.f32 %v110_v17 }
  0xf3   :  { %1778 = vrcp.f32 %v111_v19 }
  0xfc   :  { %v1777_v20 = vpop.eup %1776 }
  0xfd   :  { %v1779_v23 = vpop.eup %1778 }
 0x155   :  { %v119_v21 = vpop.permute.xlu0 %118 }
 0x156   :  { %v124_v22 = vmul.f32 %v1777_v20, %v119_v21 }
 0x158   :  { %128 = vrot.lane.b32.xlu1 %v124_v22, %s1813_s0 }
 0x159   :  { %v121_v24 = vpop.permute.xlu0 %120 }
 0x15a   :  { %v125_v25 = vmul.f32 %v1779_v23, %v121_v24 }
 0x15c   :  { %130 = vrot.lane.b32.xlu1 %v125_v25, %s1813_s0 }
 0x1ca   :  { %v129_v26 = vpop.permute.xlu1 %128 }
 0x1cb   :  { %v1867_v27 = vadd.f32 %v129_v26, %v14_v5 }
 0x1cd   :  { %v136_v28 = vsel %vm22_vm0, %v1867_v27, 0.0 }
 0x1ce   :  { %137 = vadd.xlane.f32.xlu0 %v136_v28  ;;  %v131_v29 = vpop.permute.xlu1 %130 }
 0x1cf   :  { %v1871_v30 = vadd.f32 %v131_v29, %v15_v7 }
 0x1d1   :  { %v139_v31 = vsel %vm22_vm0, %v1871_v30, 0.0 }
 0x1d2   :  { %140 = vadd.xlane.f32.xlu1 %v139_v31 }
 0x1e3   :  { %266 = vrot.lane.b32.xlu1 %v1894_v48, %s1812_s28 }
 0x1e7   :  { %270 = vrot.lane.b32.xlu1 %v1906_v50, %s1812_s28 }
 0x1eb   :  { %272 = vrot.lane.b32.xlu1 %v1920_v52, %s1812_s28 }
 0x1ef   :  { %276 = vrot.lane.b32.xlu1 %v1934_v54, %s1812_s28 }
 0x1f3   :  { %280 = vrot.lane.b32.xlu1 %v1943_v55, %s1812_s28 }
 0x25b   :  { %v138_v32 = vpop.xlane.xlu0 %137 }
 0x25c   :  { %v143_v33 = vmul.f32 0.03125, %v138_v32 }
 0x25e   :  { %v145_v34 = vsub.f32 %v1867_v27, %v143_v33 }
 0x25f   :  { %v141_v35 = vpop.xlane.xlu1 %140 }
 0x260   :  { %v144_v36 = vmul.f32 0.03125, %v141_v35  ;;  %v147_v37 = vmul.f32 %v145_v34, %v145_v34 }
 0x262   :  { %v146_v38 = vsub.f32 %v1871_v30, %v144_v36  ;;  %v149_v39 = vsel %vm22_vm0, %v147_v37, 0.0 }
 0x263   :  { %150 = vadd.xlane.f32.xlu0 %v149_v39  ;;  %v267_v2 = vpop.permute.xlu1 %266 }
 0x264   :  { %v148_v40 = vmul.f32 %v146_v38, %v146_v38 }
 0x266   :  { %v152_v41 = vsel %vm22_vm0, %v148_v40, 0.0 }
 0x267   :  { %153 = vadd.xlane.f32.xlu0 %v152_v41  ;;  %v271_v3 = vpop.permute.xlu1 %270 }
 0x26b   :  { %v273_v4 = vpop.permute.xlu1 %272 }
 0x26f   :  { %v277_v6 = vpop.permute.xlu1 %276 }
 0x273   :  { %v281_v14 = vpop.permute.xlu1 %280 }
 0x27d   :  { %268 = vrot.lane.b32.xlu0 %v1901_v49, %s1812_s28 }
 0x281   :  { %274 = vrot.lane.b32.xlu0 %v1913_v51, %s1812_s28 }
 0x285   :  { %278 = vrot.lane.b32.xlu0 %v1927_v53, %s1812_s28 }
 0x2f0   :  { %v151_v56 = vpop.xlane.xlu0 %150 }
 0x2f1   :  { %v155_v57 = vmul.f32 0.03125, %v151_v56  ;;  %v454_v56 = vld [vmem:[%s2317_s2 + $0x150] sm:$0xff] }
 0x2f3   :  { %v157_v58 = vadd.f32 1e-05, %v155_v57 }
 0x2f4   :  { %v154_v59 = vpop.xlane.xlu0 %153 }
 0x2f5   :  { %1780 = vrsqrt.f32 %v157_v58  ;;  %v156_v60 = vmul.f32 0.03125, %v154_v59  ;;  %v453_v59 = vld [vmem:[%s2317_s2 + $0x140] sm:$0xff] }
 0x2f7   :  { %v158_v61 = vadd.f32 1e-05, %v156_v60 }
 0x2f8   :  { %v269_v5 = vpop.permute.xlu0 %268 }
 0x2f9   :  { %1782 = vrsqrt.f32 %v158_v61 }
 0x2fc   :  { %v275_v7 = vpop.permute.xlu0 %274 }
 0x2ff   :  { %v1781_v62 = vpop.eup %1780 }
 0x300   :  { %v161_v63 = vmul.f32 %v1781_v62, %v145_v34  ;;  %v279_v15 = vpop.permute.xlu0 %278 }
 0x302   :  { %1496 = vmatprep.mubr.msk.f32.mxu0 %vm22_vm0, %v161_v63 }
 0x303   :  { %v1783_v0 = vpop.eup %1782 }
 0x304   :  { %v162_v1 = vmul.f32 %v1783_v0, %v146_v38 }
 0x306   :  { %1497 = vmatmul.mubr.msk.f32.vlgmr.msra.gmra.mrb[2].mxu0 %vm22_vm0, %v162_v1  ;;  %v470_v1 = vld [vmem:[%s2317_s2 + $0x160] sm:$0xff] }
 0x3d9   :  { %v1498_v10 = vpop.f32.mrb[2].mxu0 }
 0x3da   :  { %v1955_v11 = vadd.f32 %v1498_v10, %v168_v8  ;;  %v241_v12 = vpop.f32.mrb[3].mxu0  ;;  %v475_v8 = vld [vmem:[%s2317_s2 + $0x1b0] sm:$0xff] }
 0x3db   :  { %v1957_v13 = vadd.f32 %v241_v12, %v167_v9  ;;  %v477_v10 = vld [vmem:[%s2317_s2 + $0x1d0] sm:$0xff] }
 0x3dc   :  { %v291_v16 = vmul.f32 %v269_v5, %v1955_v11  ;;  %v293_v17 = vmul.f32 %v273_v4, %v1955_v11  ;;  %v297_v20 = vmul.f32 %v281_v14, %v1955_v11  ;;  %v295_v21 = vmul.f32 %v277_v6, %v1955_v11  ;;  %v472_v4 = vld [vmem:[%s2317_s2 + $0x180] sm:$0xff]  ;;  %v473_v5 = vld [vmem:[%s2317_s2 + $0x190] sm:$0xff] }
 0x3dd   :  { %1515 = vmatprep.mubr.msk.f32.mxu0 %vm22_vm0, %v1957_v13  ;;  %v290_v18 = vmul.f32 %v267_v2, %v1957_v13  ;;  %v292_v19 = vmul.f32 %v271_v3, %v1957_v13  ;;  %v296_v22 = vmul.f32 %v279_v15, %v1957_v13  ;;  %v294_v25 = vmul.f32 %v275_v7, %v1957_v13  ;;  %v471_v2 = vld [vmem:[%s2317_s2 + $0x170] sm:$0xff]  ;;  %v474_v7 = vld [vmem:[%s2317_s2 + $0x1a0] sm:$0xff] }
 0x3de   :  { %v1629_v3 = vpack.c.bf16 %v471_v2, %v470_v1  ;;  %v1633_v6 = vpack.c.bf16 %v473_v5, %v472_v4  ;;  %v1637_v9 = vpack.c.bf16 %v475_v8, %v474_v7 }
 0x3df   :  { %v1732_v23 = vpack.i.bf16 %v291_v16, %v290_v18  ;;  %v1737_v24 = vpack.i.bf16 %v293_v17, %v292_v19  ;;  %v1747_v26 = vpack.i.bf16 %v297_v20, %v296_v22  ;;  %v1742_v28 = vpack.i.bf16 %v295_v21, %v294_v25 }
 0x3e0   :  { %1630 = vmatprep.subr.bf16.mxu1 %v1629_v3 }
 0x3e1   :  { %1733 = vrot.lane.b32.xlu0 %v1732_v23, %s1813_s0  ;;  %1738 = vrot.lane.b32.xlu1 %v1737_v24, %s1813_s0 }
 0x3e2   :  { %1632 = vmatpush3.bf16.msra.mxu1 %v1629_v3 }
 0x3e3   :  { %1634 = vmatprep.subr.bf16.mxu1 %v1633_v6 }
 0x3e5   :  { %1743 = vrot.lane.b32.xlu0 %v1742_v28, %s1813_s0  ;;  %1748 = vrot.lane.b32.xlu1 %v1747_v26, %s1813_s0 }
 0x3e6   :  { %1636 = vmatpush3.bf16.msra.mxu1 %v1633_v6 }
 0x3e7   :  { %1638 = vmatprep.subr.bf16.mxu1 %v1637_v9 }
 0x3ea   :  { %1640 = vmatpush3.bf16.msra.mxu1 %v1637_v9  ;;  %v681_v9 = vld [vmem:[%s2317_s2 + $0x50] sm:$0xff] }
 0x453   :  { %v1734_v29 = vpop.permute.xlu0 %1733  ;;  %v1739_v31 = vpop.permute.xlu1 %1738 }
 0x454   :  { %v1736_v32 = vunpack.i.h.bf16 %v1734_v29  ;;  %v1735_v33 = vunpack.i.l.bf16 %v1734_v29  ;;  %v1741_v34 = vunpack.i.h.bf16 %v1739_v31  ;;  %v1740_v35 = vunpack.i.l.bf16 %v1739_v31 }
 0x456   :  { %v1605_v37 = vpack.c.bf16 %v1736_v32, %v1735_v33  ;;  %v1611_v38 = vpack.c.bf16 %v1741_v34, %v1740_v35 }
 0x457   :  { %v1744_v39 = vpop.permute.xlu0 %1743  ;;  %v1749_v43 = vpop.permute.xlu1 %1748 }
 0x458   :  { %1607 = vmatprep.subr.msk.bf16.mxu0 %vm1975_vm1, %v1605_v37  ;;  %v1746_v40 = vunpack.i.h.bf16 %v1744_v39  ;;  %v1745_v41 = vunpack.i.l.bf16 %v1744_v39  ;;  %v1751_v44 = vunpack.i.h.bf16 %v1749_v43  ;;  %v1750_v45 = vunpack.i.l.bf16 %v1749_v43  ;;  %v679_v39 = vld [vmem:[%s2315_s1 + $0xb8] sm:$0xff] }
 0x459   :  { %1610 = vmatpush3.bf16.xpose.msk.msra.mxu0 %vm1975_vm1, %v1605_v37  ;;  %v676_v37 = vld [vmem:[%s2315_s1 + $0x10] sm:$0xff] }
 0x45a   :  { %1613 = vmatprep.subr.msk.bf16.mxu0 %vm1975_vm1, %v1611_v38  ;;  %v1617_v42 = vpack.c.bf16 %v1746_v40, %v1745_v41  ;;  %v1623_v46 = vpack.c.bf16 %v1751_v44, %v1750_v45 }
 0x461   :  { %1616 = vmatpush3.bf16.xpose.msk.msra.mxu0 %vm1975_vm1, %v1611_v38  ;;  %v678_v38 = vld [vmem:[%s2315_s1 + $0x80] sm:$0xff] }
 0x462   :  { %1619 = vmatprep.subr.msk.bf16.mxu0 %vm1975_vm1, %v1617_v42  ;;  %v1665_v40 = vpack.c.bf16 %v679_v39, %v678_v38 }
 0x469   :  { %1622 = vmatpush3.bf16.xpose.msk.msra.mxu0 %vm1975_vm1, %v1617_v42 }
 0x46a   :  { %1625 = vmatprep.subr.msk.bf16.mxu0 %vm1975_vm1, %v1623_v46 }
 0x471   :  { %1628 = vmatpush3.bf16.xpose.msk.msra.mxu0 %vm1975_vm1, %v1623_v46 }
 0x478   :  { %1516 = vmatmul.mubr.msk.f32.vlgmr.msra.gmra.mrb[4].mxu0 %vm22_vm0, %v1955_v11 }
 0x54b   :  { %v1517_v47 = vpop.f32.mrb[4].mxu0 }
 0x54c   :  { %v452_v57 = vmul.f32 0.70710677, %v1517_v47  ;;  %v442_v58 = vpop.f32.mrb[5].mxu0 }
 0x54d   :  { %v451_v60 = vmul.f32 0.70710677, %v442_v58 }
 0x54e   :  { %v456_v61 = vadd.f32 %v454_v56, %v452_v57 }
 0x54f   :  { %v455_v62 = vadd.f32 %v453_v59, %v451_v60 }
 0x550   :  { %v461_v63 = vsel %vm457_vm2, %v456_v61, -inf }
 0x551   :  { %462 = vmax.xlane.f32.xlu1 %v461_v63  ;;  %v458_v0 = vsel %vm457_vm2, %v455_v62, -inf }
 0x552   :  { %459 = vmax.xlane.f32.xlu0 %v458_v0 }
 0x562   :  { %300 = vrot.lane.b32.xlu1 %v1901_v49, %s1814_s16  ;;  %v476_v49 = vld [vmem:[%s2317_s2 + $0x1c0] sm:$0xff] }
 0x563   :  { %v1641_v12 = vpack.c.bf16 %v477_v10, %v476_v49  ;;  %v680_v49 = vld [vmem:[%s2317_s2 + $0x40] sm:$0xff] }
 0x565   :  { %1642 = vmatprep.subr.bf16.mxu1 %v1641_v12 }
 0x566   :  { %304 = vrot.lane.b32.xlu1 %v1920_v52, %s1814_s16  ;;  %1644 = vmatpush3.bf16.msra.mxu1 %v1641_v12 }
 0x568   :  { %298 = vrot.lane.b32.xlu0 %v1894_v48, %s1814_s16 }
 0x56a   :  { %308 = vrot.lane.b32.xlu1 %v1934_v54, %s1814_s16 }
 0x56c   :  { %302 = vrot.lane.b32.xlu0 %v1906_v50, %s1814_s16 }
 0x56e   :  { %312 = vrot.lane.b32.xlu1 %v1943_v55, %s1814_s16 }
 0x570   :  { %306 = vrot.lane.b32.xlu0 %v1913_v51, %s1814_s16 }
 0x574   :  { %310 = vrot.lane.b32.xlu0 %v1927_v53, %s1814_s16 }
 0x5de   :  { %v463_v48 = vpop.xlane.xlu1 %462 }
 0x5df   :  { %v465_v52 = vsub.f32 %v456_v61, %v463_v48  ;;  %v460_v14 = vpop.xlane.xlu0 %459 }
 0x5e0   :  { %v464_v15 = vsub.f32 %v455_v62, %v460_v14 }
 0x5e1   :  { %v468_v54 = vmul.f32 1.442695, %v465_v52 }
 0x5e2   :  { %v466_v16 = vmul.f32 1.442695, %v464_v15  ;;  %v301_v17 = vpop.permute.xlu1 %300 }
 0x5e3   :  { %v323_v50 = vmul.f32 %v301_v17, %v1955_v11  ;;  %v299_v18 = vpop.permute.xlu0 %298 }
 0x5e4   :  { %1784 = vpow2.f32 %v466_v16  ;;  %v322_v19 = vmul.f32 %v299_v18, %v1957_v13 }
 0x5e5   :  { %1786 = vpow2.f32 %v468_v54 }
 0x5e6   :  { %v1752_v55 = vpack.i.bf16 %v323_v50, %v322_v19  ;;  %v305_v20 = vpop.permute.xlu1 %304 }
 0x5e7   :  { %v325_v51 = vmul.f32 %v305_v20, %v1955_v11  ;;  %v303_v21 = vpop.permute.xlu0 %302 }
 0x5e8   :  { %v324_v53 = vmul.f32 %v303_v21, %v1957_v13  ;;  %1753 = vrot.lane.b32.xlu0 %v1752_v55, %s1814_s16 }
 0x5ea   :  { %v1757_v22 = vpack.i.bf16 %v325_v51, %v324_v53  ;;  %v309_v23 = vpop.permute.xlu1 %308  ;;  %v792_v53 = vld [vmem:[%s2315_s1 + $0x20] sm:$0xff] }
 0x5eb   :  { %v327_v24 = vmul.f32 %v309_v23, %v1955_v11  ;;  %v307_v25 = vpop.permute.xlu0 %306 }
 0x5ec   :  { %v326_v26 = vmul.f32 %v307_v25, %v1957_v13  ;;  %1758 = vrot.lane.b32.xlu1 %v1757_v22, %s1814_s16  ;;  %v794_v22 = vld [vmem:[%s2315_s1 + $0x58] sm:$0xff]  ;;  %v793_v25 = vld [vmem:[%s2315_s1 + $0x50] sm:$0xff] }
 0x5ed   :  { %v1669_v23 = vpack.c.bf16 %v794_v22, %v792_v53  ;;  %v1024_v22 = vld [vmem:[%s2317_s2 + $0x250] sm:$0xff] }
 0x5ee   :  { %v1785_v28 = vpop.eup %1784  ;;  %v1762_v29 = vpack.i.bf16 %v327_v24, %v326_v26  ;;  %v313_v31 = vpop.permute.xlu1 %312  ;;  %v791_v24 = vld [vmem:[%s2315_s1 + $0x18] sm:$0xff] }
 0x5ef   :  { %v1787_v32 = vpop.eup %1786  ;;  %v329_v33 = vmul.f32 %v313_v31, %v1955_v11  ;;  %1534 = vmatprep.mubr.msk.f32.mxu1 %vm457_vm2, %v1785_v28  ;;  %v311_v34 = vpop.permute.xlu0 %310  ;;  %v677_v11 = vld [vmem:[%s2315_s1 + $0x48] sm:$0xff]  ;;  %v1671_v26 = vpack.c.bf16 %v793_v25, %v791_v24 }
 0x5f0   :  { %v328_v35 = vmul.f32 %v311_v34, %v1957_v13  ;;  %1535 = vmatmul.mubr.msk.f32.vlgmr.msra.gmra.mrb[0].mxu1 %vm457_vm2, %v1787_v32  ;;  %1763 = vrot.lane.b32.xlu0 %v1762_v29, %s1814_s16  ;;  %v1661_v13 = vpack.c.bf16 %v677_v11, %v676_v37  ;;  %v798_v29 = vld [vmem:[%s2315_s1 + $0xc8] sm:$0xff]  ;;  %v1815_v34 = vmov 0.0  }
 0x5f1   :  { %v795_v31 = vld [vmem:[%s2315_s1 + $0x88] sm:$0xff] }
 0x5f2   :  { %v1767_v36 = vpack.i.bf16 %v329_v33, %v328_v35  ;;  %1662 = vmatprep.subr.bf16.mxu0 %v1661_v13  ;;  %v797_v33 = vld [vmem:[%s2315_s1 + $0xc0] sm:$0xff] }
 0x5f3   :  { %1664 = vmatpush3.bf16.msra.mxu0 %v1661_v13  ;;  %v1675_v35 = vpack.c.bf16 %v797_v33, %v795_v31  ;;  %v1029_v33 = vld [vmem:[%s2317_s2 + $0x2a0] sm:$0xff] }
 0x5f4   :  { %1768 = vrot.lane.b32.xlu1 %v1767_v36, %s1814_s16  ;;  %1666 = vmatprep.subr.bf16.mxu0 %v1665_v40 }
 0x5f7   :  { %1668 = vmatpush3.bf16.msra.mxu0 %v1665_v40 }
 0x65a   :  { %v1754_v41 = vpop.permute.xlu0 %1753 }
 0x65b   :  { %v1756_v42 = vunpack.i.h.bf16 %v1754_v41  ;;  %v1755_v43 = vunpack.i.l.bf16 %v1754_v41 }
 0x65d   :  { %v1645_v44 = vpack.c.bf16 %v1756_v42, %v1755_v43 }
 0x65e   :  { %v1759_v45 = vpop.permute.xlu1 %1758 }
 0x65f   :  { %v1761_v46 = vunpack.i.h.bf16 %v1759_v45  ;;  %v1760_v47 = vunpack.i.l.bf16 %v1759_v45  ;;  %1646 = vmatprep.subr.bf16.mxu1 %v1645_v44 }
 0x660   :  { %1648 = vmatpush3.bf16.msra.mxu1 %v1645_v44  ;;  %v800_v44 = vld [vmem:[%s2317_s2 + $0x68] sm:$0xff] }
 0x661   :  { %v1649_v56 = vpack.c.bf16 %v1761_v46, %v1760_v47 }
 0x662   :  { %v1764_v57 = vpop.permute.xlu0 %1763 }
 0x663   :  { %v1766_v58 = vunpack.i.h.bf16 %v1764_v57  ;;  %v1765_v59 = vunpack.i.l.bf16 %v1764_v57  ;;  %1650 = vmatprep.subr.bf16.mxu1 %v1649_v56 }
 0x664   :  { %1652 = vmatpush3.bf16.msra.mxu1 %v1649_v56  ;;  %v802_v56 = vld [vmem:[%s2317_s2 + $0x78] sm:$0xff] }
 0x665   :  { %v1653_v60 = vpack.c.bf16 %v1766_v58, %v1765_v59 }
 0x666   :  { %v1769_v61 = vpop.permute.xlu1 %1768 }
 0x667   :  { %v1771_v62 = vunpack.i.h.bf16 %v1769_v61  ;;  %v1770_v63 = vunpack.i.l.bf16 %v1769_v61  ;;  %1654 = vmatprep.subr.bf16.mxu1 %v1653_v60 }
 0x668   :  { %1656 = vmatpush3.bf16.msra.mxu1 %v1653_v60 }
 0x669   :  { %v1657_v0 = vpack.c.bf16 %v1771_v62, %v1770_v63 }
 0x66b   :  { %1658 = vmatprep.subr.bf16.mxu1 %v1657_v0 }
 0x66c   :  { %1660 = vmatpush3.bf16.msra.mxu1 %v1657_v0 }
 0x66d   :  { %1670 = vmatprep.subr.bf16.mxu1 %v1669_v23  ;;  %v1025_v23 = vld [vmem:[%s2317_s2 + $0x260] sm:$0xff] }
 0x6c3   :  { %v1536_v1 = vpop.f32.mrb[0].mxu1 }
 0x6c4   :  { %1788 = vrcp.f32 %v1536_v1  ;;  %v550_v2 = vpop.f32.mrb[1].mxu1 }
 0x6c5   :  { %1790 = vrcp.f32 %v550_v2 }
 0x6ce   :  { %v1789_v3 = vpop.eup %1788 }
 0x6cf   :  { %v1791_v4 = vpop.eup %1790  ;;  %v2073_v6 = vmul.f32 %v1789_v3, %v1787_v32 }
 0x6d0   :  { %v2071_v5 = vmul.f32 %v1791_v4, %v1785_v28  ;;  %v796_v28 = vld [vmem:[%s2315_s1 + $0x90] sm:$0xff] }
 0x6d1   :  { %v1673_v32 = vpack.c.bf16 %v798_v29, %v796_v28  ;;  %v1026_v28 = vld [vmem:[%s2317_s2 + $0x270] sm:$0xff]  ;;  %v1027_v29 = vld [vmem:[%s2317_s2 + $0x280] sm:$0xff] }
 0x6d2   :  { %1553 = vmatprep.mubr.msk.f32.mxu1 %vm457_vm2, %v2071_v5  ;;  %v1690_v31 = vpack.c.bf16 %v1027_v29, %v1026_v28 }
 0x6d3   :  { %1554 = vmatmul.mubr.msk.f32.vlgmr.msra.gmra.mrb[2].mxu1 %vm457_vm2, %v2073_v6 }
 0x6d4   :  { %873 = vmatprep.mubr.f32.mxu1 %v1815_v34  ;;  %1672 = vmatpush1.bf16.msra.mxu1 %v1671_v26  ;;  %v1687_v26 = vpack.c.bf16 %v1025_v23, %v1024_v22 }
 0x6d5   :  { %1674 = vmatprep.subr.bf16.mxu1 %v1673_v32  ;;  %v1028_v32 = vld [vmem:[%s2317_s2 + $0x290] sm:$0xff] }
 0x6d8   :  { %1676 = vmatpush1.bf16.msra.mxu1 %v1675_v35  ;;  %v1693_v35 = vpack.c.bf16 %v1029_v33, %v1028_v32  ;;  %v1253_v32 = vld [vmem:[%s2315_s1 + $0x68] sm:$0xff] }
 0x7a6   :  { %v1555_v7 = vpop.f32.mrb[2].mxu1 }
 0x7a7   :  { %v667_v8 = vpop.f32.mrb[3].mxu1 }
 0x7a8   :  { %1564 = vmatprep.mubr.msk.f32.mxu0 %vm22_vm0, %v667_v8 }
 0x7a9   :  { %1565 = vmatmul.mubr.msk.f32.vlgmr.msra.gmra.mrb[6].mxu0 %vm22_vm0, %v1555_v7 }
 0x7aa   :  { %1001 = vmatprep.mubr.f32.mxu0 %v1815_v34 }
 0x87c   :  { %v1566_v10 = vpop.f32.mrb[6].mxu0 }
 0x87d   :  { %v760_v12 = vadd.f32 %v1566_v10, %v681_v9  ;;  %v754_v48 = vpop.f32.mrb[7].mxu0 }
 0x87e   :  { %v755_v52 = vadd.f32 %v754_v48, %v680_v49  ;;  %v918_v48 = vld [vmem:[%s2317_s2 + $0x1e0] sm:$0x1f] }
 0x87f   :  { %v2088_v14 = vadd.f32 %v760_v12, %v1871_v30  ;;  %v919_v12 = vld [vmem:[%s2317_s2 + $0x1e8] sm:$0x1f] }
 0x880   :  { %v2091_v15 = vadd.f32 %v755_v52, %v1867_v27  ;;  %1403 = vmatprep.subr.msk.mxu0 %vm930_vm5, %v919_v12 }
 0x881   :  { %v768_v54 = vsel %vm22_vm0, %v2088_v14, 0.0  ;;  %1404 = vmatpush1.msk.msra.mxu0 %vm930_vm5, %v918_v48 }
 0x882   :  { %769 = vadd.xlane.f32.xlu1 %v768_v54  ;;  %v765_v16 = vsel %vm22_vm0, %v2091_v15, 0.0 }
 0x883   :  { %766 = vadd.xlane.f32.xlu0 %v765_v16  ;;  %v1018_v16 = vld [vmem:[%s2317_s2 + $0x1f0] sm:$0xff] }
 0x90f   :  { %v770_v17 = vpop.xlane.xlu1 %769 }
 0x910   :  { %v772_v50 = vmul.f32 0.03125, %v770_v17  ;;  %v767_v18 = vpop.xlane.xlu0 %766  ;;  %v1019_v17 = vld [vmem:[%s2317_s2 + $0x200] sm:$0xff] }
 0x911   :  { %v771_v19 = vmul.f32 0.03125, %v767_v18  ;;  %v1816_v18 = vmov 0.0|0.0  }
 0x912   :  { %v774_v55 = vsub.f32 %v2088_v14, %v772_v50  ;;  %v1020_v50 = vld [vmem:[%s2317_s2 + $0x210] sm:$0xff]  ;;  %1677 = vmatprep.subr.bf16.mxu1 %v1816_v18 }
 0x913   :  { %v773_v30 = vsub.f32 %v2091_v15, %v771_v19  ;;  %v1678_v19 = vpack.c.bf16 %v1019_v17, %v1018_v16 }
 0x914   :  { %v776_v51 = vmul.f32 %v774_v55, %v774_v55 }
 0x915   :  { %v775_v20 = vmul.f32 %v773_v30, %v773_v30 }
 0x916   :  { %v780_v21 = vsel %vm22_vm0, %v776_v51, 0.0 }
 0x917   :  { %v777_v27 = vsel %vm22_vm0, %v775_v20, 0.0  ;;  %v1022_v20 = vld [vmem:[%s2317_s2 + $0x230] sm:$0xff] }
 0x918   :  { %778 = vadd.xlane.f32.xlu0 %v777_v27  ;;  %v1023_v27 = vld [vmem:[%s2317_s2 + $0x240] sm:$0xff] }
 0x919   :  { %v1684_v53 = vpack.c.bf16 %v1023_v27, %v1022_v20  ;;  %v1150_v27 = vld [vmem:[%s2315_s1 + $0xd0] sm:$0xff] }
 0x91c   :  { %781 = vadd.xlane.f32.xlu0 %v780_v21 }
 0x9a5   :  { %v779_v36 = vpop.xlane.xlu0 %778 }
 0x9a6   :  { %v783_v37 = vmul.f32 0.03125, %v779_v36  ;;  %v1030_v36 = vld [vmem:[%s2317_s2 + $0x2b0] sm:$0xff] }
 0x9a8   :  { %v785_v11 = vadd.f32 1e-05, %v783_v37  ;;  %v1031_v37 = vld [vmem:[%s2317_s2 + $0x2c0] sm:$0xff] }
 0x9a9   :  { %v782_v38 = vpop.xlane.xlu0 %781 }
 0x9aa   :  { %1792 = vrsqrt.f32 %v785_v11  ;;  %v784_v13 = vmul.f32 0.03125, %v782_v38  ;;  %v1696_v11 = vpack.c.bf16 %v1031_v37, %v1030_v36  ;;  %v1032_v38 = vld [vmem:[%s2317_s2 + $0x2d0] sm:$0xff]  ;;  %v1255_v36 = vld [vmem:[%s2315_s1 + $0xd8] sm:$0xff] }
 0x9ac   :  { %v786_v39 = vadd.f32 1e-05, %v784_v13  ;;  %v1033_v13 = vld [vmem:[%s2317_s2 + $0x2e0] sm:$0xff] }
 0x9ae   :  { %1794 = vrsqrt.f32 %v786_v39  ;;  %v1699_v39 = vpack.c.bf16 %v1033_v13, %v1032_v38  ;;  %v1151_v38 = vld [vmem:[%s2317_s2 + $0x80] sm:$0xff] }
 0x9b4   :  { %v1793_v40 = vpop.eup %1792 }
 0x9b5   :  { %v789_v41 = vmul.f32 %v1793_v40, %v773_v30  ;;  %v1034_v40 = vld [vmem:[%s2317_s2 + $0x2f0] sm:$0xff] }
 0x9b7   :  { %1401 = vmatmul.mubr.msk.f32.vlgmr.msra.gmra.mrb[4].mxu1 %vm22_vm0, %v789_v41  ;;  %v1035_v41 = vld [vmem:[%s2317_s2 + $0x300] sm:$0xff] }
 0x9b8   :  { %v1795_v42 = vpop.eup %1794  ;;  %879 = vmatprep.mubr.f32.mxu1 %v1815_v34  ;;  %1679 = vmatpush1.bf16.msra.mxu1 %v1678_v19 }
 0x9b9   :  { %v790_v43 = vmul.f32 %v1795_v42, %v774_v55  ;;  %v1021_v55 = vld [vmem:[%s2317_s2 + $0x220] sm:$0xff]  ;;  %1680 = vmatprep.subr.bf16.mxu1 %v1816_v18  ;;  %v1702_v42 = vpack.c.bf16 %v1035_v41, %v1034_v40 }
 0x9ba   :  { %v1681_v30 = vpack.c.bf16 %v1021_v55, %v1020_v50  ;;  %v1147_v55 = vld [vmem:[%s2315_s1 + $0x28] sm:$0xff] }
 0x9bb   :  { %1402 = vmatmul.mubr.msk.f32.gmra.mrb[6].mxu1 %vm22_vm0, %v790_v43 }
 0x9bc   :  { %1682 = vmatpush1.bf16.msra.mxu1 %v1681_v30  ;;  %v1148_v30 = vld [vmem:[%s2315_s1 + $0x60] sm:$0xff] }
 0x9bd   :  { %1683 = vmatprep.subr.bf16.mxu1 %v1816_v18  ;;  %v1707_v20 = vpack.c.bf16 %v1148_v30, %v1147_v55 }
 0x9bf   :  { %1708 = vmatprep.subr.bf16.mxu0 %v1707_v20 }
 0x9c0   :  { %1685 = vmatpush1.bf16.msra.mxu1 %v1684_v53 }
 0x9c1   :  { %1686 = vmatprep.subr.bf16.mxu1 %v1816_v18 }
 0x9c4   :  { %1688 = vmatpush1.bf16.msra.mxu1 %v1687_v26 }
 0x9c5   :  { %1689 = vmatprep.subr.bf16.mxu1 %v1816_v18 }
 0x9c8   :  { %1691 = vmatpush1.bf16.msra.mxu1 %v1690_v31  ;;  %v1252_v31 = vld [vmem:[%s2315_s1 + $0x30] sm:$0xff] }
 0x9c9   :  { %1692 = vmatprep.subr.bf16.mxu1 %v1816_v18  ;;  %v1715_v33 = vpack.c.bf16 %v1253_v32, %v1252_v31 }
 0x9cc   :  { %1694 = vmatpush1.bf16.msra.mxu1 %v1693_v35  ;;  %v1254_v35 = vld [vmem:[%s2315_s1 + $0xa0] sm:$0xff] }
 0x9cd   :  { %1695 = vmatprep.subr.bf16.mxu1 %v1816_v18  ;;  %v1721_v37 = vpack.c.bf16 %v1255_v36, %v1254_v35 }
 0x9d0   :  { %1697 = vmatpush1.bf16.msra.mxu1 %v1696_v11  ;;  %v1152_v11 = vld [vmem:[%s2317_s2 + $0x90] sm:$0xff] }
 0x9d1   :  { %1698 = vmatprep.subr.bf16.mxu1 %v1816_v18 }
 0x9d4   :  { %1700 = vmatpush1.bf16.msra.mxu1 %v1699_v39 }
 0x9d5   :  { %1701 = vmatprep.subr.bf16.mxu1 %v1816_v18 }
 0x9d8   :  { %1703 = vmatpush1.bf16.msra.mxu1 %v1702_v42 }
 0x9d9   :  { %1704 = vmatprep.subr.bf16.mxu1 %v1816_v18 }
 0xa8a   :  { %v2133_v45 = vpop.f32.mrb[4].mxu1 }
 0xa8b   :  { %v877_v46 = vpop.f32.mrb[5].mxu1 }
 0xa8c   :  { %v2135_v47 = vadd.f32 %v877_v46, %v800_v44  ;;  %v1036_v46 = vld [vmem:[%s2317_s2 + $0x310] sm:$0xff] }
 0xa8e   :  { %v2140_v57 = vpop.f32.mrb[6].mxu1  ;;  %v887_v58 = vsel %vm886_vm3, %v2135_v47, -inf }
 0xa8f   :  { %888 = vmax.xlane.f32.xlu1 %v887_v58  ;;  %v883_v59 = vpop.f32.mrb[7].mxu1 }
 0xa90   :  { %v2143_v60 = vadd.f32 %v883_v59, %v802_v56  ;;  %v1037_v56 = vld [vmem:[%s2317_s2 + $0x320] sm:$0xff] }
 0xa91   :  { %v1705_v58 = vpack.c.bf16 %v1037_v56, %v1036_v46  ;;  %v799_v59 = vld [vmem:[%s2317_s2 + $0x60] sm:$0xff] }
 0xa92   :  { %v890_v61 = vsel %vm886_vm3, %v2143_v60, -inf }
 0xa93   :  { %891 = vmax.xlane.f32.xlu0 %v890_v61  ;;  %1706 = vmatpush1.bf16.msra.mxu1 %v1705_v58  ;;  %v876_v61 = vadd.f32 %v2133_v45, %v799_v59 }
 0xb1c   :  { %v889_v62 = vpop.xlane.xlu1 %888 }
 0xb1d   :  { %v893_v63 = vsub.f32 %v2135_v47, %v889_v62 }
 0xb1f   :  { %v895_v0 = vmul.f32 1.442695, %v893_v63 }
 0xb20   :  { %v892_v1 = vpop.xlane.xlu0 %891 }
 0xb21   :  { %1796 = vpow2.f32 %v895_v0  ;;  %v894_v2 = vsub.f32 %v2143_v60, %v892_v1 }
 0xb23   :  { %v897_v3 = vmul.f32 1.442695, %v894_v2 }
 0xb25   :  { %1798 = vpow2.f32 %v897_v3 }
 0xb2b   :  { %v1797_v4 = vpop.eup %1796 }
 0xb2c   :  { %901 = vrot.lane.b32.xlu1 %v1797_v4, %s1813_s0 }
 0xb2f   :  { %v1799_v7 = vpop.eup %1798 }
 0xb30   :  { %903 = vrot.lane.b32.xlu0 %v1799_v7, %s1813_s0 }
 0xb9e   :  { %v902_v8 = vpop.permute.xlu1 %901 }
 0xb9f   :  { %v908_v9 = vsel %vm907_vm4, %v902_v8, 0.0 }
 0xba0   :  { %909 = vadd.xlane.f32.xlu1 %v908_v9 }
 0xba2   :  { %v904_v49 = vpop.permute.xlu0 %903 }
 0xba3   :  { %v911_v10 = vsel %vm907_vm4, %v904_v49, 0.0 }
 0xba4   :  { %912 = vadd.xlane.f32.xlu0 %v911_v10 }
 0xc2d   :  { %v910_v52 = vpop.xlane.xlu1 %909 }
 0xc2e   :  { %1800 = vrcp.f32 %v910_v52 }
 0xc31   :  { %v913_v54 = vpop.xlane.xlu0 %912 }
 0xc32   :  { %1802 = vrcp.f32 %v913_v54 }
 0xc38   :  { %v1801_v51 = vpop.eup %1800 }
 0xc39   :  { %v2176_v21 = vmul.f32 %v1801_v51, %v1797_v4 }
 0xc3b   :  { %922 = vrot.lane.b32.xlu1 %v2176_v21, %s1813_s0 }
 0xc3c   :  { %v1803_v24 = vpop.eup %1802 }
 0xc3d   :  { %v2186_v25 = vmul.f32 %v1803_v24, %v1799_v7 }
 0xc3f   :  { %924 = vrot.lane.b32.xlu0 %v2186_v25, %s1813_s0 }
 0xcad   :  { %v923_v43 = vpop.permute.xlu1 %922 }
 0xcae   :  { %1405 = vmatmul.mubr.msk.f32.vlgmr.msra.gmra.mrb[8].mxu0 %vm907_vm4, %v923_v43 }
 0xcaf   :  { %1007 = vmatprep.mubr.f32.mxu0 %v1815_v34  ;;  %v801_v34 = vld [vmem:[%s2317_s2 + $0x70] sm:$0xff]  ;;  %1710 = vmatpush3.bf16.msra.mxu0 %v1707_v20 }
 0xcb0   :  { %v882_v2 = vadd.f32 %v2140_v57, %v801_v34 }
 0xcb1   :  { %v925_v44 = vpop.permute.xlu0 %924 }
 0xcb2   :  { %1406 = vmatmul.mubr.msk.f32.gmra.mrb[10].mxu0 %vm907_vm4, %v925_v44 }
 0xd81   :  { %v1003_v62 = vpop.f32.mrb[8].mxu0 }
 0xd82   :  { %v1014_v63 = vmul.f32 %v1003_v62, %v876_v61  ;;  %v1005_v0 = vpop.f32.mrb[9].mxu0 }
 0xd83   :  { %v1015_v1 = vmul.f32 %v1005_v0, %v2135_v47 }
 0xd85   :  { %v1009_v3 = vpop.f32.mrb[10].mxu0  ;;  %1407 = vmatprep.mubr.msk.f32.mxu1 %vm22_vm0, %v1015_v1 }
 0xd86   :  { %v1016_v4 = vmul.f32 %v1009_v3, %v882_v2  ;;  %v1011_v7 = vpop.f32.mrb[11].mxu0  ;;  %1109 = vmatmul.mubr.f32.vlgmr.msra.gmra.mrb[8].mxu1 %v1014_v63 }
 0xd87   :  { %v1017_v8 = vmul.f32 %v1011_v7, %v2143_v60 }
 0xd89   :  { %1408 = vmatprep.mubr.msk.f32.mxu1 %vm22_vm0, %v1017_v8 }
 0xd8a   :  { %1114 = vmatmul.mubr.f32.gmra.mrb[10].mxu1 %v1016_v4 }
 0xe59   :  { %v1110_v45 = vpop.f32.mrb[8].mxu1 }
 0xe5a   :  { %v2242_v9 = vadd.f32 %v1110_v45, %v2091_v15  ;;  %v1112_v49 = vpop.f32.mrb[9].mxu1 }
 0xe5b   :  { %v1257_v49 = vld [vmem:[%s2317_s2 + $0xb0] sm:$0xff] }
 0xe5c   :  { %v1121_v47 = vsel %vm22_vm0, %v2242_v9, 0.0 }
 0xe5d   :  { %1122 = vadd.xlane.f32.xlu1 %v1121_v47  ;;  %v1115_v57 = vpop.f32.mrb[10].mxu1 }
 0xe5e   :  { %v2247_v10 = vadd.f32 %v1115_v57, %v2088_v14  ;;  %v1117_v12 = vpop.f32.mrb[11].mxu1  ;;  %v1256_v57 = vld [vmem:[%s2317_s2 + $0xa0] sm:$0xff] }
 0xe60   :  { %v1124_v60 = vsel %vm22_vm0, %v2247_v10, 0.0 }
 0xe61   :  { %1125 = vadd.xlane.f32.xlu0 %v1124_v60 }
 0xeea   :  { %v1123_v48 = vpop.xlane.xlu1 %1122 }
 0xeeb   :  { %v1127_v52 = vmul.f32 0.03125, %v1123_v48 }
 0xeed   :  { %v1129_v54 = vsub.f32 %v2242_v9, %v1127_v52 }
 0xeee   :  { %v1126_v15 = vpop.xlane.xlu0 %1125 }
 0xeef   :  { %v1128_v16 = vmul.f32 0.03125, %v1126_v15  ;;  %v1131_v17 = vmul.f32 %v1129_v54, %v1129_v54 }
 0xef1   :  { %v1130_v50 = vsub.f32 %v2247_v10, %v1128_v16  ;;  %v1133_v18 = vsel %vm22_vm0, %v1131_v17, 0.0 }
 0xef2   :  { %1134 = vadd.xlane.f32.xlu1 %v1133_v18 }
 0xef3   :  { %v1132_v19 = vmul.f32 %v1130_v50, %v1130_v50 }
 0xef5   :  { %v1136_v14 = vsel %vm22_vm0, %v1132_v19, 0.0 }
 0xef6   :  { %1137 = vadd.xlane.f32.xlu0 %v1136_v14 }
 0xf03   :  { %1353 = vrot.lane.b32.xlu1 %v2071_v5, %s1812_s28  ;;  %v1149_v5 = vld [vmem:[%s2315_s1 + $0x98] sm:$0xff] }
 0xf04   :  { %v1711_v51 = vpack.c.bf16 %v1150_v27, %v1149_v5 }
 0xf06   :  { %1712 = vmatprep.subr.bf16.mxu0 %v1711_v51 }
 0xf07   :  { %1359 = vrot.lane.b32.xlu1 %v2176_v21, %s1814_s16  ;;  %1714 = vmatpush3.bf16.msra.mxu0 %v1711_v51 }
 0xf08   :  { %1717 = vmatprep.subr.msk.bf16.mxu0 %vm1716_vm6, %v1715_v33 }
 0xf0b   :  { %1361 = vrot.lane.b32.xlu1 %v2186_v25, %s1814_s16 }
 0xf0c   :  { %1355 = vrot.lane.b32.xlu0 %v2073_v6, %s1812_s28 }
 0xf7f   :  { %v1135_v21 = vpop.xlane.xlu1 %1134 }
 0xf80   :  { %v1139_v53 = vmul.f32 0.03125, %v1135_v21 }
 0xf82   :  { %v1141_v22 = vadd.f32 1e-05, %v1139_v53 }
 0xf83   :  { %v1138_v23 = vpop.xlane.xlu0 %1137  ;;  %v1354_v45 = vpop.permute.xlu1 %1353 }
 0xf84   :  { %1804 = vrsqrt.f32 %v1141_v22  ;;  %v1140_v24 = vmul.f32 0.03125, %v1138_v23 }
 0xf86   :  { %v1142_v6 = vadd.f32 1e-05, %v1140_v24 }
 0xf87   :  { %v1360_v47 = vpop.permute.xlu1 %1359  ;;  %v1356_v15 = vpop.permute.xlu0 %1355 }
 0xf88   :  { %1806 = vrsqrt.f32 %v1142_v6 }
 0xf8b   :  { %v1362_v17 = vpop.permute.xlu1 %1361 }
 0xf8e   :  { %v1805_v25 = vpop.eup %1804 }
 0xf8f   :  { %v1145_v26 = vmul.f32 %v1805_v25, %v1129_v54 }
 0xf91   :  { %1575 = vmatprep.mubr.msk.f32.mxu0 %vm22_vm0, %v1145_v26 }
 0xf92   :  { %v1807_v28 = vpop.eup %1806 }
 0xf93   :  { %v1146_v29 = vmul.f32 %v1807_v28, %v1130_v50 }
 0xf95   :  { %1576 = vmatmul.mubr.msk.f32.vlgmr.msra.gmra.mrb[12].mxu0 %vm22_vm0, %v1146_v29 }
 0xf96   :  { %1720 = vmatpush3.bf16.xpose.msk.msra.mxu0 %vm1716_vm6, %v1715_v33 }
 0xf97   :  { %1723 = vmatprep.subr.msk.bf16.mxu0 %vm1716_vm6, %v1721_v37 }
 0xf9e   :  { %1726 = vmatpush3.bf16.xpose.msk.msra.mxu0 %vm1716_vm6, %v1721_v37 }
0x1068   :  { %v1577_v13 = vpop.f32.mrb[12].mxu0 }
0x1069   :  { %v1231_v39 = vadd.f32 %v1577_v13, %v1152_v11  ;;  %v1225_v40 = vpop.f32.mrb[13].mxu0 }
0x106a   :  { %v1226_v41 = vadd.f32 %v1225_v40, %v1151_v38 }
0x106b   :  { %v1235_v42 = vmul.f32 %v1231_v39, %v1231_v39 }
0x106c   :  { %v1234_v43 = vmul.f32 %v1226_v41, %v1226_v41 }
0x106d   :  { %v1237_v44 = vmul.f32 %v1235_v42, %v1231_v39 }
0x106e   :  { %v1236_v46 = vmul.f32 %v1234_v43, %v1226_v41 }
0x106f   :  { %v1239_v56 = vmul.f32 0.044715, %v1237_v44 }
0x1070   :  { %v1238_v58 = vmul.f32 0.044715, %v1236_v46 }
0x1071   :  { %v1241_v59 = vadd.f32 %v1239_v56, %v1231_v39 }
0x1072   :  { %v1240_v61 = vadd.f32 %v1238_v58, %v1226_v41 }
0x1073   :  { %v1243_v34 = vmul.f32 0.7978846, %v1241_v59 }
0x1074   :  { %v1242_v62 = vmul.f32 0.7978846, %v1240_v61 }
0x1075   :  { %1808 = vtanh.f32 %v1243_v34 }
0x1076   :  { %1810 = vtanh.f32 %v1242_v62 }
0x107f   :  { %v1809_v63 = vpop.eup %1808 }
0x1080   :  { %v1811_v0 = vpop.eup %1810  ;;  %v1247_v1 = vadd.f32 1.0, %v1809_v63 }
0x1081   :  { %v1246_v2 = vadd.f32 1.0, %v1811_v0 }
0x1082   :  { %v1249_v3 = vmul.f32 0.5, %v1247_v1 }
0x1083   :  { %v1248_v4 = vmul.f32 0.5, %v1246_v2 }
0x1084   :  { %v1251_v8 = vmul.f32 %v1249_v3, %v1231_v39 }
0x1085   :  { %v1250_v7 = vmul.f32 %v1248_v4, %v1226_v41 }
0x1087   :  { %1586 = vmatprep.mubr.msk.f32.mxu0 %vm457_vm2, %v1250_v7 }
0x1088   :  { %1587 = vmatmul.mubr.msk.f32.vlgmr.msra.gmra.mrb[14].mxu0 %vm457_vm2, %v1251_v8 }
0x115b   :  { %v1588_v12 = vpop.f32.mrb[14].mxu0 }
0x115c   :  { %v1348_v60 = vadd.f32 %v1588_v12, %v1257_v49  ;;  %v1342_v48 = vpop.f32.mrb[15].mxu0 }
0x115d   :  { %v1343_v52 = vadd.f32 %v1342_v48, %v1256_v57 }
0x115e   :  { %v1352_v54 = vadd.f32 %v1348_v60, %v2247_v10 }
0x115f   :  { %v1351_v16 = vadd.f32 %v1343_v52, %v2242_v9 }
0x1160   :  { %v1366_v50 = vsel %vm22_vm0, %v1352_v54, %v1356_v15 }
0x1161   :  { %v1369_v18 = vsel %vm1367_vm7, %v1366_v50, %v1362_v17  ;;  %v1365_v19 = vsel %vm22_vm0, %v1351_v16, %v1354_v45 }
0x1162   :  { %v1372_v14 = vsel %vm1370_vm8, %v1369_v18, 0.0  ;;  %v1368_v55 = vsel %vm1367_vm7, %v1365_v19, %v1360_v47 }
0x1163   :  { %1374 = vst [vmem:[%s2318_s3 + $0x8] sm:$0xff] %v1372_v14  ;;  %v1371_v30 = vsel %vm1370_vm8, %v1368_v55, 0.0 }
0x1164   :  { %1373 = vst [vmem:[%s2318_s3] sm:$0xff] %v1371_v30 }

</bundles_post_ra>
